<compile_context>
chip_gen: v5e
topology: v5e:2x2
jax: 0.10.0
libtpu: 0.0.40
codegen_flags: <defaults>
</compile_context>

<pallas_src>
import jax
import jax.numpy as jnp
from jax.experimental import pallas as pl
from jax.experimental.pallas import tpu as pltpu

EPS = 1e-5


# ------------------------------ fused Pallas kernel -------------------------------- #

def _decoder_fused_kernel(x_ref, w1_ref, b1_ref, w2_ref, b2_ref, wd_ref, bd_ref,
                          o_ref, xpad_ref, ypad_ref):
    # x_ref  : (B, H, W*Cin)        bf16  flattened NHWC input rows (whole batch block)
    # w1_ref : (3, W*Cin, W*Cmid)   bf16  banded conv1 weights (BN scale folded in)
    # b1_ref : (1, W*Cmid)          f32   fused (conv-bias + BN) shift, tiled over w
    # w2_ref : (3, W*Cmid, W*Cout)  bf16  banded conv2 weights (BN scale folded in)
    # b2_ref : (1, W*Cout)          f32
    # wd_ref : (W*Cout, 4*W*Cout)   bf16  deconv-as-matmul weights (dy/dx interleave)
    # bd_ref : (1, 4*W*Cout)        f32
    # o_ref  : (B, H, 4*W*Cout)     bf16  == (2H, 2W, Cout) after a free reshape outside
    # xpad_ref/ypad_ref: (B, H+2, W*C) bf16 VMEM zero-halo scratches (height padding).
    B, H, WCI = x_ref.shape
    WM = w1_ref.shape[2]
    WO = w2_ref.shape[2]
    M = B * H

    def conv3x3_bias_relu(pad_ref, w_ref, b_ref):
        # Three overlapping row windows of the halo scratch -> three MXU dots that
        # accumulate into one f32 accumulator.  Width taps + width zero-padding are
        # already folded into the banded weights; height padding is the scratch halo.
        k = pad_ref.shape[2]
        t0 = pad_ref[:, 0:H, :].reshape(M, k)
        t1 = pad_ref[:, 1:H + 1, :].reshape(M, k)
        t2 = pad_ref[:, 2:H + 2, :].reshape(M, k)
        acc = jnp.dot(t0, w_ref[0], preferred_element_type=jnp.float32)
        acc = acc + jnp.dot(t1, w_ref[1], preferred_element_type=jnp.float32)
        acc = acc + jnp.dot(t2, w_ref[2], preferred_element_type=jnp.float32)
        # fused (conv bias + BN shift) and ReLU, f32 on the VPU.
        return jnp.maximum(acc + b_ref[...], 0.0)

    # ---- conv1: stage input once into the zero-halo scratch (bf16, no casts) ----
    zx = jnp.zeros((B, 1, WCI), xpad_ref.dtype)
    xpad_ref[:, 0:1, :] = zx
    xpad_ref[:, H + 1:H + 2, :] = zx
    xpad_ref[:, 1:H + 1, :] = x_ref[...]

    y1 = conv3x3_bias_relu(xpad_ref, w1_ref, b1_ref)          # (M, W*Cmid) f32
    # Dropout(0.5): identity in eval mode.

    # ---- conv2: stage the (bf16) intermediate into its own halo scratch ----
    zy = jnp.zeros((B, 1, WM), ypad_ref.dtype)
    ypad_ref[:, 0:1, :] = zy
    ypad_ref[:, H + 1:H + 2, :] = zy
    ypad_ref[:, 1:H + 1, :] = y1.reshape(B, H, WM).astype(ypad_ref.dtype)

    y2 = conv3x3_bias_relu(ypad_ref, w2_ref, b2_ref)          # (M, W*Cout) f32

    # ---- ConvTranspose2d(k=2, s=2) as one lane-dense matmul + bias ----
    out = jnp.dot(y2.astype(wd_ref.dtype), wd_ref[...],
                  preferred_element_type=jnp.float32) + bd_ref[...]
    o_ref[...] = out.reshape(B, H, out.shape[1]).astype(o_ref.dtype)


# -------------------------- banded weight construction ----------------------------- #

def _banded_conv3x3(w_pt, W):
    """Conv2d(3x3, pad=1) as 3 banded matrices over the flattened (W*Cin) width axis.

    Returns (3, W*Cin, W*Cout):  out_row[h] = sum_ky input_row[h+ky-1] @ band[ky],
    with band[ky][wi*Cin+ci, wo*Cout+co] = w_pt[co, ci, ky, wi-wo+1] inside the band
    (zero outside — this also implements the width zero-padding)."""
    Co, Ci, _, _ = w_pt.shape
    w_k = jnp.transpose(w_pt, (2, 3, 1, 0))                  # (ky, kx, Ci, Co)
    wi = jnp.arange(W)[:, None]
    wo = jnp.arange(W)[None, :]
    kx = wi - wo + 1                                         # (W, W)
    valid = (kx >= 0) & (kx <= 2)
    band = w_k[:, jnp.clip(kx, 0, 2)]                        # (3, W, W, Ci, Co)
    band = band * valid[None, :, :, None, None]
    band = jnp.transpose(band, (0, 1, 3, 2, 4))              # (3, W, Ci, W, Co)
    return band.reshape(3, W * Ci, W * Co)


def _banded_deconv2x2(wt_pt, W):
    """ConvTranspose2d(k=2, s=2) as one (W*C, 2*2W*C) matrix whose column index is
    dy*(2W*C) + (2w+dx)*C + co, so the matmul output row IS the interleaved pair of
    output image rows (2h, 2h+1)."""
    Ci, Co, _, _ = wt_pt.shape
    wt_k = jnp.transpose(wt_pt, (2, 3, 0, 1))                # (dy, dx, Ci, Co)
    ww = jnp.arange(2 * W)[None, :]
    wo = jnp.arange(W)[:, None]
    dx = ww - 2 * wo                                         # (W, 2W)
    valid = (dx >= 0) & (dx <= 1)
    D = wt_k[:, jnp.clip(dx, 0, 1)]                          # (2, W, 2W, Ci, Co)
    D = D * valid[None, :, :, None, None]
    D = jnp.transpose(D, (1, 3, 0, 2, 4))                    # (W, Ci, dy, 2W, Co)
    return D.reshape(W * Ci, 2 * 2 * W * Co)


# ----------------------------------- parameters ------------------------------------ #

def make_params(key, cin, cmid, cout, W):
    kc1, kc2, kt = jax.random.split(key, 3)

    def conv_block(k, ci, co):
        k0, k1, k2, k3, k4, k5 = jax.random.split(k, 6)
        w_pt = 0.1 * jax.random.normal(k0, (co, ci, 3, 3), jnp.float32)   # PyTorch OIHW
        b = 0.1 * jax.random.normal(k1, (co,), jnp.float32)
        gamma = jax.random.uniform(k2, (co,), jnp.float32, 0.5, 1.5)
        beta = 0.1 * jax.random.normal(k3, (co,), jnp.float32)
        rmean = 0.1 * jax.random.normal(k4, (co,), jnp.float32)
        rvar = jax.random.uniform(k5, (co,), jnp.float32, 0.5, 1.5)
        # fold conv bias + eval-mode BN into a per-channel scale/bias; the SCALE is
        # folded into the banded weight columns (f32 multiply, then bf16 cast).
        scale = gamma / jnp.sqrt(rvar + EPS)
        bias = (b - rmean) * scale + beta
        band = _banded_conv3x3(w_pt, W) * jnp.tile(scale, W)[None, None, :]
        raw = dict(w_pt=w_pt, b=b, gamma=gamma, beta=beta, rmean=rmean, rvar=rvar)
        return band.astype(jnp.bfloat16), jnp.tile(bias, W)[None, :], raw

    w1, b1, raw1 = conv_block(kc1, cin, cmid)
    w2, b2, raw2 = conv_block(kc2, cmid, cout)

    k0, k1 = jax.random.split(kt)
    wt_pt = 0.1 * jax.random.normal(k0, (cout, cout, 2, 2), jnp.float32)  # PyTorch (I, O, kH, kW)
    bt = 0.1 * jax.random.normal(k1, (cout,), jnp.float32)
    wd = _banded_deconv2x2(wt_pt, W).astype(jnp.bfloat16)
    bd = jnp.tile(bt, 2 * 2 * W)[None, :]

    params = dict(w1=w1, b1=b1, w2=w2, b2=b2, wd=wd, bd=bd)
    raw = dict(c1=raw1, c2=raw2, wt_pt=wt_pt, bt=bt)
    return params, raw


# ----------------------------------- forward pass ----------------------------------- #

@jax.jit
def decoder_forward(x_nhwc, params):
    """NHWC in, NHWC out: (N, H, W, Cin) -> (N, 2H, 2W, Cout).  Only free reshapes."""
    N, H, W, Cin = x_nhwc.shape
    WM = params["w1"].shape[2]          # W * Cmid
    WO = params["w2"].shape[2]          # W * Cout
    OUTW = params["wd"].shape[1]        # 4 * W * Cout
    Cout = WO // W

    # lane-dense flattened rows (free reshape) + bf16 for the HBM/MXU stream.
    x = x_nhwc.reshape(N, H, W * Cin).astype(jnp.bfloat16)

    # Whole batch in one grid step: M = N*H per matmul, no per-step pipeline overhead,
    # constants fetched once.  (v7x: use B = N//2 per step with "parallel" to use both
    # TensorCores once N*H is large enough.)
    B = N

    out = pl.pallas_call(
        _decoder_fused_kernel,
        out_shape=jax.ShapeDtypeStruct((N, H, OUTW), jnp.bfloat16),
        grid=(N // B,),
        in_specs=[
            pl.BlockSpec((B, H, W * Cin), lambda n: (n, 0, 0)),
            pl.BlockSpec((3, W * Cin, WM), lambda n: (0, 0, 0)),
            pl.BlockSpec((1, WM), lambda n: (0, 0)),
            pl.BlockSpec((3, WM, WO), lambda n: (0, 0, 0)),
            pl.BlockSpec((1, WO), lambda n: (0, 0)),
            pl.BlockSpec((WO, OUTW), lambda n: (0, 0)),
            pl.BlockSpec((1, OUTW), lambda n: (0, 0)),
        ],
        out_specs=pl.BlockSpec((B, H, OUTW), lambda n: (n, 0, 0)),
        scratch_shapes=[
            pltpu.VMEM((B, H + 2, W * Cin), jnp.bfloat16),   # conv1 zero-halo input
            pltpu.VMEM((B, H + 2, WM), jnp.bfloat16),        # conv2 zero-halo input
        ],
        compiler_params=pltpu.CompilerParams(
            dimension_semantics=("parallel",)),
    )(x, params["w1"], params["b1"], params["w2"], params["b2"],
      params["wd"], params["bd"])

    # (N, H, 2*2W*Cout) -> (N, 2H, 2W, Cout) is a layout-preserving (free) reshape.
    return out.reshape(N, 2 * H, 2 * W, Cout)


# ------------------------------------ reference ------------------------------------- #

def decoder_reference(x_nhwc, raw):
    """Pure-JAX f32 reference (eval-mode semantics), NHWC in / NHWC out."""

    def conv_bn_relu_ref(x, p):
        w_hwio = jnp.transpose(p["w_pt"], (2, 3, 1, 0))
        y = jax.lax.conv_general_dilated(
            x, w_hwio, (1, 1), "SAME",
            dimension_numbers=("NHWC", "HWIO", "NHWC")) + p["b"]
        y = (y - p["rmean"]) / jnp.sqrt(p["rvar"] + EPS) * p["gamma"] + p["beta"]
        return jnp.maximum(y, 0.0)

    x = conv_bn_relu_ref(x_nhwc, raw["c1"])
    x = conv_bn_relu_ref(x, raw["c2"])
    N, H, W, C = x.shape
    t = jnp.einsum("nhwi,ioyx->nhywxo", x, raw["wt_pt"])      # (N,H,2,W,2,C)
    return t.reshape(N, 2 * H, 2 * W, C) + raw["bt"]


# -------------------------------------- main ---------------------------------------- #

if __name__ == "__main__":
    N, Cin, Cmid, Cout, H, W = 2, 4, 8, 4, 16, 16
    key = jax.random.PRNGKey(0)
    kx, kp = jax.random.split(key)

    # PyTorch-style NCHW sample input; the model itself is NHWC end-to-end, so this
    # single producer-side transpose is the only layout shuffle anywhere.
    x_nchw = jax.random.normal(kx, (N, Cin, H, W), jnp.float32)
    x_nhwc = jnp.transpose(x_nchw, (0, 2, 3, 1))

    params, raw = make_params(kp, Cin, Cmid, Cout, W)

    out = jax.block_until_ready(decoder_forward(x_nhwc, params))
    assert out.shape == (N, 2 * H, 2 * W, Cout), out.shape

    ref = jax.block_until_ready(decoder_reference(x_nhwc, raw))
    # Kernel uses bf16 MXU operands / bf16 output (f32 accumulation); tolerance sized
    # accordingly.
    out_f32 = out.astype(jnp.float32)
    max_err = float(jnp.max(jnp.abs(out_f32 - ref)))
    assert jnp.allclose(out_f32, ref, atol=5e-2, rtol=5e-2), max_err

    print("KERNEL_OK")
</pallas_src>

<mosaic_0001>
module attributes {stable_mosaic.version = 11 : i64} {
  func.func @_decoder_fused_kernel(%arg0: i32, %arg1: memref<2x16x64xbf16, #tpu.memory_space<vmem>>, %arg2: memref<3x64x128xbf16, #tpu.memory_space<vmem>>, %arg3: memref<1x128xf32, #tpu.memory_space<vmem>>, %arg4: memref<3x128x64xbf16, #tpu.memory_space<vmem>>, %arg5: memref<1x64xf32, #tpu.memory_space<vmem>>, %arg6: memref<64x256xbf16, #tpu.memory_space<vmem>>, %arg7: memref<1x256xf32, #tpu.memory_space<vmem>>, %arg8: memref<2x16x256xbf16, #tpu.memory_space<vmem>>, %arg9: memref<2x18x64xbf16, #tpu.memory_space<vmem>>, %arg10: memref<2x18x128xbf16, #tpu.memory_space<vmem>>) attributes {dimension_semantics = [#tpu.dimension_semantics<parallel>], iteration_bounds = array<i64: 1>, scalar_prefetch = 0 : i64, scratch_operands = 2 : i64, tpu.core_type = #tpu.core_type<tc>, window_params = [{transform_indices = @transform_0, window_bounds = array<i64: 2, 16, 64>}, {pipeline_mode = #tpu.pipeline_mode<synchronous>, transform_indices = @transform_1, window_bounds = array<i64: 3, 64, 128>}, {pipeline_mode = #tpu.pipeline_mode<synchronous>, transform_indices = @transform_2, window_bounds = array<i64: 1, 128>}, {pipeline_mode = #tpu.pipeline_mode<synchronous>, transform_indices = @transform_3, window_bounds = array<i64: 3, 128, 64>}, {pipeline_mode = #tpu.pipeline_mode<synchronous>, transform_indices = @transform_4, window_bounds = array<i64: 1, 64>}, {pipeline_mode = #tpu.pipeline_mode<synchronous>, transform_indices = @transform_5, window_bounds = array<i64: 64, 256>}, {pipeline_mode = #tpu.pipeline_mode<synchronous>, transform_indices = @transform_6, window_bounds = array<i64: 1, 256>}, {transform_indices = @transform_7, window_bounds = array<i64: 2, 16, 256>}]} {
    %cst = arith.constant 0.000000e+00 : bf16
    %0 = vector.broadcast %cst : bf16 to vector<2x1x64xbf16>
    %c0 = arith.constant 0 : index
    %c0_0 = arith.constant 0 : index
    %c0_1 = arith.constant 0 : index
    %1 = vector.load %arg9[%c0, %c0_0, %c0_1] : memref<2x18x64xbf16, #tpu.memory_space<vmem>>, vector<2x1x64xbf16>
    tpu.vector_store %arg9[%c0, %c0_0, %c0_1], %0 {strides = array<i32>} : memref<2x18x64xbf16, #tpu.memory_space<vmem>>, vector<2x1x64xbf16>,
    %c0_2 = arith.constant 0 : index
    %c17 = arith.constant 17 : index
    %c0_3 = arith.constant 0 : index
    %2 = vector.load %arg9[%c0_2, %c17, %c0_3] : memref<2x18x64xbf16, #tpu.memory_space<vmem>>, vector<2x1x64xbf16>
    tpu.vector_store %arg9[%c0_2, %c17, %c0_3], %0 {strides = array<i32>} : memref<2x18x64xbf16, #tpu.memory_space<vmem>>, vector<2x1x64xbf16>,
    %c0_4 = arith.constant 0 : index
    %c0_5 = arith.constant 0 : index
    %c0_6 = arith.constant 0 : index
    %3 = vector.load %arg1[%c0_4, %c0_5, %c0_6] : memref<2x16x64xbf16, #tpu.memory_space<vmem>>, vector<2x16x64xbf16>
    %c0_7 = arith.constant 0 : index
    %c1 = arith.constant 1 : index
    %c0_8 = arith.constant 0 : index
    %4 = vector.load %arg9[%c0_7, %c1, %c0_8] : memref<2x18x64xbf16, #tpu.memory_space<vmem>>, vector<2x16x64xbf16>
    tpu.vector_store %arg9[%c0_7, %c1, %c0_8], %3 {strides = array<i32>} : memref<2x18x64xbf16, #tpu.memory_space<vmem>>, vector<2x16x64xbf16>,
    %c0_9 = arith.constant 0 : index
    %c0_10 = arith.constant 0 : index
    %c0_11 = arith.constant 0 : index
    %5 = vector.load %arg9[%c0_9, %c0_10, %c0_11] : memref<2x18x64xbf16, #tpu.memory_space<vmem>>, vector<2x16x64xbf16>
    %6 = vector.shape_cast %5 : vector<2x16x64xbf16> to vector<32x64xbf16>
    %c0_12 = arith.constant 0 : index
    %c1_13 = arith.constant 1 : index
    %c0_14 = arith.constant 0 : index
    %7 = vector.load %arg9[%c0_12, %c1_13, %c0_14] : memref<2x18x64xbf16, #tpu.memory_space<vmem>>, vector<2x16x64xbf16>
    %8 = vector.shape_cast %7 : vector<2x16x64xbf16> to vector<32x64xbf16>
    %c0_15 = arith.constant 0 : index
    %c2 = arith.constant 2 : index
    %c0_16 = arith.constant 0 : index
    %9 = vector.load %arg9[%c0_15, %c2, %c0_16] : memref<2x18x64xbf16, #tpu.memory_space<vmem>>, vector<2x16x64xbf16>
    %10 = vector.shape_cast %9 : vector<2x16x64xbf16> to vector<32x64xbf16>
    %c0_17 = arith.constant 0 : index
    %c0_18 = arith.constant 0 : index
    %c0_19 = arith.constant 0 : index
    %11 = vector.load %arg2[%c0_17, %c0_18, %c0_19] : memref<3x64x128xbf16, #tpu.memory_space<vmem>>, vector<1x64x128xbf16>
    %12 = vector.shape_cast %11 : vector<1x64x128xbf16> to vector<64x128xbf16>
    %cst_20 = arith.constant dense<0.000000e+00> : vector<32x128xf32>
    %13 = tpu.matmul %6, %12, %cst_20 {dimension_numbers = #tpu.dot_dimension_numbers<[1], [0], [0], [1], [0, 0, 1, 1], [], []>} : vector<32x64xbf16>, vector<64x128xbf16>, vector<32x128xf32> -> vector<32x128xf32>
    %c1_21 = arith.constant 1 : index
    %c0_22 = arith.constant 0 : index
    %c0_23 = arith.constant 0 : index
    %14 = vector.load %arg2[%c1_21, %c0_22, %c0_23] : memref<3x64x128xbf16, #tpu.memory_space<vmem>>, vector<1x64x128xbf16>
    %15 = vector.shape_cast %14 : vector<1x64x128xbf16> to vector<64x128xbf16>
    %cst_24 = arith.constant dense<0.000000e+00> : vector<32x128xf32>
    %16 = tpu.matmul %8, %15, %cst_24 {dimension_numbers = #tpu.dot_dimension_numbers<[1], [0], [0], [1], [0, 0, 1, 1], [], []>} : vector<32x64xbf16>, vector<64x128xbf16>, vector<32x128xf32> -> vector<32x128xf32>
    %17 = arith.addf %13, %16 : vector<32x128xf32>
    %c2_25 = arith.constant 2 : index
    %c0_26 = arith.constant 0 : index
    %c0_27 = arith.constant 0 : index
    %18 = vector.load %arg2[%c2_25, %c0_26, %c0_27] : memref<3x64x128xbf16, #tpu.memory_space<vmem>>, vector<1x64x128xbf16>
    %19 = vector.shape_cast %18 : vector<1x64x128xbf16> to vector<64x128xbf16>
    %cst_28 = arith.constant dense<0.000000e+00> : vector<32x128xf32>
    %20 = tpu.matmul %10, %19, %cst_28 {dimension_numbers = #tpu.dot_dimension_numbers<[1], [0], [0], [1], [0, 0, 1, 1], [], []>} : vector<32x64xbf16>, vector<64x128xbf16>, vector<32x128xf32> -> vector<32x128xf32>
    %21 = arith.addf %17, %20 : vector<32x128xf32>
    %c0_29 = arith.constant 0 : index
    %c0_30 = arith.constant 0 : index
    %22 = vector.load %arg3[%c0_29, %c0_30] : memref<1x128xf32, #tpu.memory_space<vmem>>, vector<1x128xf32>
    %23 = vector.broadcast %22 : vector<1x128xf32> to vector<32x128xf32>
    %24 = arith.addf %21, %23 : vector<32x128xf32>
    %cst_31 = arith.constant 0.000000e+00 : f32
    %25 = vector.broadcast %cst_31 : f32 to vector<32x128xf32>
    %26 = arith.maximumf %24, %25 : vector<32x128xf32>
    %cst_32 = arith.constant 0.000000e+00 : bf16
    %27 = vector.broadcast %cst_32 : bf16 to vector<2x1x128xbf16>
    %c0_33 = arith.constant 0 : index
    %c0_34 = arith.constant 0 : index
    %c0_35 = arith.constant 0 : index
    %28 = vector.load %arg10[%c0_33, %c0_34, %c0_35] : memref<2x18x128xbf16, #tpu.memory_space<vmem>>, vector<2x1x128xbf16>
    tpu.vector_store %arg10[%c0_33, %c0_34, %c0_35], %27 {strides = array<i32>} : memref<2x18x128xbf16, #tpu.memory_space<vmem>>, vector<2x1x128xbf16>,
    %c0_36 = arith.constant 0 : index
    %c17_37 = arith.constant 17 : index
    %c0_38 = arith.constant 0 : index
    %29 = vector.load %arg10[%c0_36, %c17_37, %c0_38] : memref<2x18x128xbf16, #tpu.memory_space<vmem>>, vector<2x1x128xbf16>
    tpu.vector_store %arg10[%c0_36, %c17_37, %c0_38], %27 {strides = array<i32>} : memref<2x18x128xbf16, #tpu.memory_space<vmem>>, vector<2x1x128xbf16>,
    %30 = vector.shape_cast %26 : vector<32x128xf32> to vector<2x16x128xf32>
    %31 = arith.truncf %30 : vector<2x16x128xf32> to vector<2x16x128xbf16>
    %c0_39 = arith.constant 0 : index
    %c1_40 = arith.constant 1 : index
    %c0_41 = arith.constant 0 : index
    %32 = vector.load %arg10[%c0_39, %c1_40, %c0_41] : memref<2x18x128xbf16, #tpu.memory_space<vmem>>, vector<2x16x128xbf16>
    tpu.vector_store %arg10[%c0_39, %c1_40, %c0_41], %31 {strides = array<i32>} : memref<2x18x128xbf16, #tpu.memory_space<vmem>>, vector<2x16x128xbf16>,
    %c0_42 = arith.constant 0 : index
    %c0_43 = arith.constant 0 : index
    %c0_44 = arith.constant 0 : index
    %33 = vector.load %arg10[%c0_42, %c0_43, %c0_44] : memref<2x18x128xbf16, #tpu.memory_space<vmem>>, vector<2x16x128xbf16>
    %34 = vector.shape_cast %33 : vector<2x16x128xbf16> to vector<32x128xbf16>
    %c0_45 = arith.constant 0 : index
    %c1_46 = arith.constant 1 : index
    %c0_47 = arith.constant 0 : index
    %35 = vector.load %arg10[%c0_45, %c1_46, %c0_47] : memref<2x18x128xbf16, #tpu.memory_space<vmem>>, vector<2x16x128xbf16>
    %36 = vector.shape_cast %35 : vector<2x16x128xbf16> to vector<32x128xbf16>
    %c0_48 = arith.constant 0 : index
    %c2_49 = arith.constant 2 : index
    %c0_50 = arith.constant 0 : index
    %37 = vector.load %arg10[%c0_48, %c2_49, %c0_50] : memref<2x18x128xbf16, #tpu.memory_space<vmem>>, vector<2x16x128xbf16>
    %38 = vector.shape_cast %37 : vector<2x16x128xbf16> to vector<32x128xbf16>
    %c0_51 = arith.constant 0 : index
    %c0_52 = arith.constant 0 : index
    %c0_53 = arith.constant 0 : index
    %39 = vector.load %arg4[%c0_51, %c0_52, %c0_53] : memref<3x128x64xbf16, #tpu.memory_space<vmem>>, vector<1x128x64xbf16>
    %40 = vector.shape_cast %39 : vector<1x128x64xbf16> to vector<128x64xbf16>
    %cst_54 = arith.constant dense<0.000000e+00> : vector<32x64xf32>
    %41 = tpu.matmul %34, %40, %cst_54 {dimension_numbers = #tpu.dot_dimension_numbers<[1], [0], [0], [1], [0, 0, 1, 1], [], []>} : vector<32x128xbf16>, vector<128x64xbf16>, vector<32x64xf32> -> vector<32x64xf32>
    %c1_55 = arith.constant 1 : index
    %c0_56 = arith.constant 0 : index
    %c0_57 = arith.constant 0 : index
    %42 = vector.load %arg4[%c1_55, %c0_56, %c0_57] : memref<3x128x64xbf16, #tpu.memory_space<vmem>>, vector<1x128x64xbf16>
    %43 = vector.shape_cast %42 : vector<1x128x64xbf16> to vector<128x64xbf16>
    %cst_58 = arith.constant dense<0.000000e+00> : vector<32x64xf32>
    %44 = tpu.matmul %36, %43, %cst_58 {dimension_numbers = #tpu.dot_dimension_numbers<[1], [0], [0], [1], [0, 0, 1, 1], [], []>} : vector<32x128xbf16>, vector<128x64xbf16>, vector<32x64xf32> -> vector<32x64xf32>
    %45 = arith.addf %41, %44 : vector<32x64xf32>
    %c2_59 = arith.constant 2 : index
    %c0_60 = arith.constant 0 : index
    %c0_61 = arith.constant 0 : index
    %46 = vector.load %arg4[%c2_59, %c0_60, %c0_61] : memref<3x128x64xbf16, #tpu.memory_space<vmem>>, vector<1x128x64xbf16>
    %47 = vector.shape_cast %46 : vector<1x128x64xbf16> to vector<128x64xbf16>
    %cst_62 = arith.constant dense<0.000000e+00> : vector<32x64xf32>
    %48 = tpu.matmul %38, %47, %cst_62 {dimension_numbers = #tpu.dot_dimension_numbers<[1], [0], [0], [1], [0, 0, 1, 1], [], []>} : vector<32x128xbf16>, vector<128x64xbf16>, vector<32x64xf32> -> vector<32x64xf32>
    %49 = arith.addf %45, %48 : vector<32x64xf32>
    %c0_63 = arith.constant 0 : index
    %c0_64 = arith.constant 0 : index
    %50 = vector.load %arg5[%c0_63, %c0_64] : memref<1x64xf32, #tpu.memory_space<vmem>>, vector<1x64xf32>
    %51 = vector.broadcast %50 : vector<1x64xf32> to vector<32x64xf32>
    %52 = arith.addf %49, %51 : vector<32x64xf32>
    %cst_65 = arith.constant 0.000000e+00 : f32
    %53 = vector.broadcast %cst_65 : f32 to vector<32x64xf32>
    %54 = arith.maximumf %52, %53 : vector<32x64xf32>
    %55 = arith.truncf %54 : vector<32x64xf32> to vector<32x64xbf16>
    %c0_66 = arith.constant 0 : index
    %c0_67 = arith.constant 0 : index
    %56 = vector.load %arg6[%c0_66, %c0_67] : memref<64x256xbf16, #tpu.memory_space<vmem>>, vector<64x256xbf16>
    %cst_68 = arith.constant dense<0.000000e+00> : vector<32x256xf32>
    %57 = tpu.matmul %55, %56, %cst_68 {dimension_numbers = #tpu.dot_dimension_numbers<[1], [0], [0], [1], [0, 0, 1, 1], [], []>} : vector<32x64xbf16>, vector<64x256xbf16>, vector<32x256xf32> -> vector<32x256xf32>
    %c0_69 = arith.constant 0 : index
    %c0_70 = arith.constant 0 : index
    %58 = vector.load %arg7[%c0_69, %c0_70] : memref<1x256xf32, #tpu.memory_space<vmem>>, vector<1x256xf32>
    %59 = vector.broadcast %58 : vector<1x256xf32> to vector<32x256xf32>
    %60 = arith.addf %57, %59 : vector<32x256xf32>
    %61 = vector.shape_cast %60 : vector<32x256xf32> to vector<2x16x256xf32>
    %62 = arith.truncf %61 : vector<2x16x256xf32> to vector<2x16x256xbf16>
    %c0_71 = arith.constant 0 : index
    %c0_72 = arith.constant 0 : index
    %c0_73 = arith.constant 0 : index
    %63 = vector.load %arg8[%c0_71, %c0_72, %c0_73] : memref<2x16x256xbf16, #tpu.memory_space<vmem>>, vector<2x16x256xbf16>
    tpu.vector_store %arg8[%c0_71, %c0_72, %c0_73], %62 {strides = array<i32>} : memref<2x16x256xbf16, #tpu.memory_space<vmem>>, vector<2x16x256xbf16>,
    return
  }
  func.func @transform_0(%arg0: i32) -> (i32, i32, i32) {
    %c0_i32 = arith.constant 0 : i32
    %c0_i32_0 = arith.constant 0 : i32
    %c0_i32_1 = arith.constant 0 : i32
    return %arg0, %c0_i32, %c0_i32_0 : i32, i32, i32
  }
  func.func @transform_1(%arg0: i32) -> (i32, i32, i32) {
    %c0_i32 = arith.constant 0 : i32
    %c0_i32_0 = arith.constant 0 : i32
    %c0_i32_1 = arith.constant 0 : i32
    %c0_i32_2 = arith.constant 0 : i32
    return %c0_i32, %c0_i32_0, %c0_i32_1 : i32, i32, i32
  }
  func.func @transform_2(%arg0: i32) -> (i32, i32) {
    %c0_i32 = arith.constant 0 : i32
    %c0_i32_0 = arith.constant 0 : i32
    %c0_i32_1 = arith.constant 0 : i32
    return %c0_i32, %c0_i32_0 : i32, i32
  }
  func.func @transform_3(%arg0: i32) -> (i32, i32, i32) {
    %c0_i32 = arith.constant 0 : i32
    %c0_i32_0 = arith.constant 0 : i32
    %c0_i32_1 = arith.constant 0 : i32
    %c0_i32_2 = arith.constant 0 : i32
    return %c0_i32, %c0_i32_0, %c0_i32_1 : i32, i32, i32
  }
  func.func @transform_4(%arg0: i32) -> (i32, i32) {
    %c0_i32 = arith.constant 0 : i32
    %c0_i32_0 = arith.constant 0 : i32
    %c0_i32_1 = arith.constant 0 : i32
    return %c0_i32, %c0_i32_0 : i32, i32
  }
  func.func @transform_5(%arg0: i32) -> (i32, i32) {
    %c0_i32 = arith.constant 0 : i32
    %c0_i32_0 = arith.constant 0 : i32
    %c0_i32_1 = arith.constant 0 : i32
    return %c0_i32, %c0_i32_0 : i32, i32
  }
  func.func @transform_6(%arg0: i32) -> (i32, i32) {
    %c0_i32 = arith.constant 0 : i32
    %c0_i32_0 = arith.constant 0 : i32
    %c0_i32_1 = arith.constant 0 : i32
    return %c0_i32, %c0_i32_0 : i32, i32
  }
  func.func @transform_7(%arg0: i32) -> (i32, i32, i32) {
    %c0_i32 = arith.constant 0 : i32
    %c0_i32_0 = arith.constant 0 : i32
    %c0_i32_1 = arith.constant 0 : i32
    return %arg0, %c0_i32, %c0_i32_0 : i32, i32, i32
  }
}

</mosaic_0001>

<bundles_post_ra>
// kernel: decoder_forward.1
= control target key start
LH: loop header
LB: loop body
LE: loop exit
PB: predicated region body
PF: predicated region fallthrough
CT: control target
= control target key end

     0   :  { %vm27_vm0 = vcmask 516096   ;;  %vm28_vm1 = vsmask.f32 256  ;;  %v30_v3 = vld [vmem:[#allocation2] sm:$0x1]  ;;  %vm90_vm5 = vcmask 519168   ;;  %s1626_s1 = inlined_call_operand.vmem [shape: bf16[3,64,128], index: 1, kind: input, shape index: {}]   ;;  %s1627_s0 = inlined_call_operand.vmem [shape: bf16[2,16,64], index: 0, kind: input, shape index: {}]   ;;  %s1628_s2 = inlined_call_operand.vmem [shape: f32[1,128], index: 2, kind: input, shape index: {}]   ;;  %s1629_s3 = inlined_call_operand.vmem [shape: bf16[3,128,64], index: 3, kind: input, shape index: {}]   ;;  %s1630_s4 = inlined_call_operand.vmem [shape: f32[1,64], index: 4, kind: input, shape index: {}]   ;;  %s1631_s5 = inlined_call_operand.vmem [shape: bf16[64,256], index: 5, kind: input, shape index: {}]   ;;  %s1632_s6 = inlined_call_operand.vmem [shape: f32[1,256], index: 6, kind: input, shape index: {}]   ;;  %s1633_s7 = inlined_call_operand.vmem [shape: bf16[2,16,256], index: 7, kind: output, shape index: {}]  }
   0x1   :  { %v1214_v0 = vld [vmem:[%s1626_s1 + $0x18] sm:$0xff]  ;;  %vm36_vm2 = vsmask.f32 7938  ;;  %v1213_v4 = vld [vmem:[%s1626_s1 + $0x10] sm:$0xff]  ;;  %vm1319_vm3 = vmand %vm27_vm0, %vm28_vm1  ;;  %vm48_vm4 = vsmask.f32 4368 }
   0x2   :  { %v1222_v1 = vld [vmem:[%s1626_s1 + $0x58] sm:$0xff]  ;;  %304 = vmatpush.bf16.msra.mxu1 %v1214_v0  ;;  %v1221_v5 = vld [vmem:[%s1626_s1 + $0x50] sm:$0xff]  ;;  %v44_v8 = vld [vmem:[%s1627_s0] sm:$0xf]  ;;  %v31_v10 = vsel %vm1319_vm3, 0, %v30_v3  ;;  %vm172_vm9 = vcmask 1042432  }
   0x3   :  { %v1218_v2 = vld [vmem:[%s1626_s1 + $0x38] sm:$0xff]  ;;  %368 = vmatpush.bf16.msra.mxu2 %v1222_v1  ;;  %v1217_v6 = vld [vmem:[%s1626_s1 + $0x30] sm:$0xff]  ;;  %v1212_v9 = vld [vmem:[%s1626_s1 + $0x8] sm:$0xff]  ;;  %v51_v13 = vshrl.u32 %v44_v8, 16  ;;  %v54_v14 = vshll.u32 %v44_v8, 16  ;;  %vm173_vm10 = vcmask 1046532  }
   0x4   :  { %247 = vmatpush.bf16.msra.mxu0 %v1218_v2  ;;  %vm1333_vm6 = vmand %vm27_vm0, %vm36_vm2  ;;  %v45_v12 = vld [vmem:[%s1627_s0 + $0x4] sm:$0xf]  ;;  %32 = vst [vmem:[#allocation2] sm:$0x1] %v31_v10  ;;  %v38_v17 = vld [vmem:[#allocation2 + $0x8] sm:$0x1] }
   0x5   :  { %v59_v15 = vshrl.u32 %v45_v12, 16  ;;  %v62_v16 = vshll.u32 %v45_v12, 16  ;;  %v1220_v18 = vld [vmem:[%s1626_s1 + $0x48] sm:$0xff]  ;;  %v53_v19 = vrot.slane %v51_v13, 7  ;;  %v39_v21 = vsel %vm1333_vm6, 0, %v38_v17  ;;  %vm1355_vm7 = vmor %vm28_vm1, %vm48_vm4  ;;  %v1211_v35 = vld [vmem:[%s1626_s1] sm:$0xff] }
   0x6   :  { %305 = vmatpush.bf16.msra.mxu1 %v1213_v4  ;;  %v1216_v20 = vld [vmem:[%s1626_s1 + $0x28] sm:$0xff]  ;;  %40 = vst [vmem:[#allocation2 + $0x8] sm:$0x1] %v39_v21  ;;  %v41_v34 = vld [vmem:[#allocation2 + $0x14] sm:$0x1]  ;;  %v1219_v36 = vld [vmem:[%s1626_s1 + $0x40] sm:$0xff] }
   0x7   :  { %369 = vmatpush.bf16.msra.mxu2 %v1221_v5  ;;  %v33_v22 = vld [vmem:[#allocation2 + $0xc] sm:$0x1]  ;;  %v61_v23 = vrot.slane %v59_v15, 7  ;;  %v46_v25 = vld [vmem:[%s1627_s0 + $0x8] sm:$0xf]  ;;  %v57_v27 = vrot.slane %v53_v19, 4  ;;  %v56_v30 = vor.u32 %v54_v14, %v53_v19  ;;  %vm1370_vm8 = vmand %vm90_vm5, %vm36_vm2 }
   0x8   :  { %248 = vmatpush.bf16.msra.mxu0 %v1217_v6  ;;  %v34_v24 = vsel %vm1319_vm3, 0, %v33_v22  ;;  %v47_v28 = vld [vmem:[%s1627_s0 + $0xc] sm:$0xf]  ;;  %v68_v29 = vshrl.u32 %v46_v25, 16  ;;  %v71_v32 = vshll.u32 %v46_v25, 16  ;;  %v42_v40 = vsel %vm1333_vm6, 0, %v41_v34  ;;  %vm1393_vm13 = vmor %vm172_vm9, %vm173_vm10 }
   0x9   :  { %35 = vst [vmem:[#allocation2 + $0xc] sm:$0x1] %v34_v24  ;;  %v64_v31 = vor.u32 %v62_v16, %v61_v23  ;;  %v76_v33 = vshrl.u32 %v47_v28, 16  ;;  %v79_v39 = vshll.u32 %v47_v28, 16  ;;  %v66_v42 = vrot.slane %v61_v23, 4  ;;  %v1215_v43 = vld [vmem:[%s1626_s1 + $0x20] sm:$0xff] }
   0xa   :  { %306 = vmatpush.bf16.msra.mxu1 %v1212_v9  ;;  %v70_v38 = vrot.slane %v68_v29, 7  ;;  %43 = vst [vmem:[#allocation2 + $0x14] sm:$0x1] %v42_v40  ;;  %vm113_vm11 = vsmask.f32 3328  ;;  %vm236_vm12 = vcmask 523264  }
   0xb   :  { %370 = vmatpush.bf16.msra.mxu2 %v1220_v18  ;;  %v65_v41 = vsel %vm1355_vm7, %v57_v27, %v64_v31  ;;  %v78_v44 = vrot.slane %v76_v33, 7  ;;  %v92_v45 = vld [vmem:[#allocation2] sm:$0xf]  ;;  %vm114_vm14 = vsmask.f32 7440  ;;  %vm399_vm0 = vcmask 1040384  }
   0xc   :  { %249 = vmatpush.bf16.msra.mxu0 %v1216_v20  ;;  %96 = vst.msk [vmem:[#allocation2 + $0x4] sm:$0xf] %vm90_vm5, %v65_v41  ;;  %v73_v46 = vor.u32 %v71_v32, %v70_v38  ;;  %v74_v47 = vrot.slane %v70_v38, 4  ;;  %v93_v48 = vsel %vm1370_vm8, %v56_v30, %v92_v45  ;;  %vm1403_vm15 = vmor %vm113_vm11, %vm114_vm14  ;;  %vm458_vm4 = vcmask 1043456   ;;  %v1199_v59 = vld [vmem:[%s1631_s5 + $0x30] sm:$0xf] }
   0xd   :  { %v81_v49 = vor.u32 %v79_v39, %v78_v44  ;;  %94 = vst [vmem:[#allocation2] sm:$0xf] %v93_v48  ;;  %v97_v50 = vld [vmem:[#allocation2 + $0x8] sm:$0x1]  ;;  %v83_v53 = vrot.slane %v78_v44, 4 }
   0xe   :  { %307 = vmatpush.bf16.msra.mxu1 %v1211_v35  ;;  %v98_v51 = vsel %vm1319_vm3, %v66_v42, %v97_v50  ;;  %v1201_v18 = vld [vmem:[%s1631_s5 + $0x38] sm:$0xf0] }
   0xf   :  { %371 = vmatpush.bf16.msra.mxu2 %v1219_v36  ;;  %v82_v52 = vsel %vm1355_vm7, %v74_v47, %v81_v49  ;;  %99 = vst [vmem:[#allocation2 + $0x8] sm:$0x1] %v98_v51 }
  0x10   :  { %250 = vmatpush.bf16.msra.mxu0 %v1215_v43  ;;  %v100_v54 = vld [vmem:[#allocation2 + $0xc] sm:$0xf]  ;;  %103 = vst.msk [vmem:[#allocation2 + $0x10] sm:$0xf] %vm90_vm5, %v82_v52  ;;  %vm1522_vm5 = vmand %vm458_vm4, %vm36_vm2 }
  0x11   :  { %v101_v55 = vsel %vm1370_vm8, %v73_v46, %v100_v54  ;;  %v104_v56 = vld [vmem:[#allocation2 + $0x14] sm:$0x1] }
  0x12   :  { %102 = vst [vmem:[#allocation2 + $0xc] sm:$0xf] %v101_v55  ;;  %v105_v58 = vsel %vm1319_vm3, %v83_v53, %v104_v56  ;;  %vm1428_vm3 = vmand %vm399_vm0, %vm28_vm1 }
  0x13   :  { %v108_v57 = vld [vmem:[#allocation2 + $0x4] sm:$0xf]  ;;  %106 = vst [vmem:[#allocation2 + $0x14] sm:$0x1] %v105_v58  ;;  %vm1450_vm1 = vmand %vm399_vm0, %vm36_vm2 }
  0x14   :  { %v177_v60 = vrot.slane %v108_v57, 5  ;;  %v126_v61 = vshll.u32 %v108_v57, 16  ;;  %v130_v62 = vshrl.u32 %v108_v57, 16  ;;  %v1209_v63 = vld [vmem:[#allocation2] sm:$0xff] }
  0x15   :  { %v164_v0 = vld [vmem:[#allocation2] sm:$0xe]  ;;  %1007 = vmatmul.msk.bf16.vlgmr.msra.gmra.mxu1 %vm236_vm12, %v1209_v63 }
  0x16   :  { %v107_v1 = vld [vmem:[#allocation2] sm:$0xf]  ;;  %v955_v2 = vrot.slane %v164_v0, 9  ;;  %v179_v3 = vrot.slane %v177_v60, 4  ;;  %v111_v6 = vld [vmem:[#allocation2 + $0x8] sm:$0x1] }
  0x17   :  { %v117_v4 = vshrl.u32 %v107_v1, 16  ;;  %v120_v5 = vshll.u32 %v107_v1, 16  ;;  %v128_v7 = vrot.slane %v126_v61, 5  ;;  %v132_v8 = vrot.slane %v130_v62, 4  ;;  %v110_v16 = vld [vmem:[#allocation2 + $0x10] sm:$0xf] }
  0x18   :  { %v178_v9 = vsel %vm1393_vm13, %v955_v2, %v177_v60  ;;  %v180_v10 = vrot.slane %v111_v6, 5  ;;  %v136_v15 = vshll.u32 %v111_v6, 16  ;;  %v150_v21 = vshll.u32 %v110_v16, 16  ;;  %v1232_v0 = vld [vmem:[%s1629_s3 + $0x38] sm:$0xff]  ;;  %v1230_v6 = vld [vmem:[%s1629_s3 + $0x28] sm:$0xff] }
  0x19   :  { %v119_v11 = vrot.slane %v117_v4, 4  ;;  %v122_v12 = vrot.slane %v120_v5, 5  ;;  %v328_v13 = vunpack.c.l.b16 %v178_v9  ;;  %v133_v14 = vor.u32 %v132_v8, %v128_v7  ;;  %v109_v20 = vld [vmem:[#allocation2 + $0xc] sm:$0xf]  ;;  %716 = vmatpush.bf16.msrb.mxu0 %v1232_v0  ;;  %v401_v1 = vld [vmem:[#allocation3] sm:$0x1] }
  0x1a   :  { %v181_v17 = vsel %vm1393_vm13, %v179_v3, %v180_v10  ;;  %v138_v24 = vrot.slane %v136_v15, 5  ;;  %v141_v25 = vshrl.u32 %v109_v20, 16  ;;  %v165_v28 = vld [vmem:[#allocation2 + $0xc] sm:$0xe]  ;;  %v184_v29 = vrot.slane %v110_v16, 5  ;;  %v1231_v3 = vld [vmem:[%s1629_s3 + $0x30] sm:$0xff] }
  0x1b   :  { %v123_v19 = vor.u32 %v122_v12, %v119_v11  ;;  %v329_v22 = vunpack.c.l.b16 %v181_v17  ;;  %v134_v23 = vrot.slane %v133_v14, 4  ;;  %v112_v32 = vld [vmem:[#allocation2 + $0x14] sm:$0x1]  ;;  %v144_v36 = vshll.u32 %v109_v20, 16  ;;  %v1210_v48 = vld [vmem:[#allocation2 + $0xc] sm:$0xff]  ;;  %v1248_v5 = vld [vmem:[%s1629_s3 + $0xb8] sm:$0xff] }
  0x1c   :  { %v143_v35 = vrot.slane %v141_v25, 4  ;;  %v956_v38 = vrot.slane %v165_v28, 9  ;;  %v152_v39 = vrot.slane %v150_v21, 5  ;;  %v154_v40 = vshrl.u32 %v110_v16, 16  ;;  %808 = vmatpush.bf16.msrb.mxu1 %v1248_v5  ;;  %v1247_v8 = vld [vmem:[%s1629_s3 + $0xb0] sm:$0xff]  ;;  %v1229_v12 = vld [vmem:[%s1629_s3 + $0x20] sm:$0xff] }
  0x1d   :  { %v124_v27 = vrot.slane %v123_v19, 4  ;;  %v332_v30 = vpack.c.b16 %v329_v22, %v328_v13  ;;  %v139_v31 = vsel %vm1403_vm15, %v134_v23, %v138_v24  ;;  %v186_v41 = vrot.slane %v184_v29, 4  ;;  %717 = vmatpush.bf16.msrb.mxu0 %v1231_v3  ;;  %v408_v10 = vld [vmem:[#allocation3 + $0x8] sm:$0x1]  ;;  %v1239_v13 = vld [vmem:[%s1629_s3 + $0x70] sm:$0xff]  ;;  %v1246_v14 = vld [vmem:[%s1629_s3 + $0xa8] sm:$0xff] }
  0x1e   :  { %v207_v34 = vunpack.c.l.b16 %v139_v31  ;;  %v187_v42 = vrot.slane %v112_v32, 5  ;;  %v146_v43 = vrot.slane %v144_v36, 5  ;;  %v160_v44 = vshll.u32 %v112_v32, 16  ;;  %v1228_v15 = vld [vmem:[%s1629_s3 + $0x18] sm:$0xff]  ;;  %v1238_v16 = vld [vmem:[%s1629_s3 + $0x68] sm:$0xff]  ;;  %v1245_v17 = vld [vmem:[%s1629_s3 + $0xa0] sm:$0xff] }
  0x1f   :  { %v129_v33 = vsel %vm1403_vm15, %v124_v27, %v128_v7  ;;  %1033 = vmatmul.msk.bf16.vlgmr.msra.gmra.mxu2 %vm236_vm12, %v332_v30  ;;  %v156_v46 = vrot.slane %v154_v40, 4  ;;  %v185_v50 = vsel %vm1393_vm13, %v956_v38, %v184_v29  ;;  %v402_v4 = vsel %vm1428_vm3, 0, %v401_v1  ;;  %v1240_v7 = vld [vmem:[%s1629_s3 + $0x78] sm:$0xff]  ;;  %v1227_v19 = vld [vmem:[%s1629_s3 + $0x10] sm:$0xff]  ;;  %v404_v20 = vld [vmem:[#allocation3 + $0xc] sm:$0x1] }
  0x20   :  { %v206_v37 = vunpack.c.l.b16 %v129_v33  ;;  %v147_v47 = vor.u32 %v146_v43, %v143_v35  ;;  %v188_v51 = vsel %vm1393_vm13, %v186_v41, %v187_v42  ;;  %v162_v53 = vrot.slane %v160_v44, 5  ;;  %403 = vst [vmem:[#allocation3] sm:$0x1] %v402_v4  ;;  %639 = vmatpush.bf16.msra.mxu3 %v1240_v7  ;;  %809 = vmatpush.bf16.msrb.mxu1 %v1247_v8  ;;  %v1237_v23 = vld [vmem:[%s1629_s3 + $0x60] sm:$0xff]  ;;  %v1244_v24 = vld [vmem:[%s1629_s3 + $0x98] sm:$0xff]  ;;  %v1226_v25 = vld [vmem:[%s1629_s3 + $0x8] sm:$0xff] }
  0x21   :  { %v157_v49 = vor.u32 %v156_v46, %v152_v39  ;;  %v330_v55 = vunpack.c.l.b16 %v185_v50  ;;  %v331_v56 = vunpack.c.l.b16 %v188_v51  ;;  %718 = vmatpush.bf16.msrb.mxu0 %v1230_v6  ;;  %v409_v11 = vsel %vm1450_vm1, 0, %v408_v10  ;;  %v1236_v28 = vld [vmem:[%s1629_s3 + $0x58] sm:$0xff]  ;;  %v1243_v29 = vld [vmem:[%s1629_s3 + $0x90] sm:$0xff]  ;;  %v1225_v30 = vld [vmem:[%s1629_s3] sm:$0xff] }
  0x22   :  { %v210_v45 = vpack.c.b16 %v207_v34, %v206_v37  ;;  %v148_v52 = vrot.slane %v147_v47, 4  ;;  %410 = vst [vmem:[#allocation3 + $0x8] sm:$0x1] %v409_v11  ;;  %v405_v22 = vsel %vm1428_vm3, 0, %v404_v20  ;;  %v1500_v32 = vld [vmem:[%s1628_s2] ss:$0 sm:$0xff] }
  0x23   :  { %v158_v54 = vrot.slane %v157_v49, 4  ;;  %v333_v60 = vpack.c.b16 %v331_v56, %v330_v55  ;;  %406 = vst [vmem:[#allocation3 + $0xc] sm:$0x1] %v405_v22  ;;  %v411_v33 = vld [vmem:[#allocation3 + $0x14] sm:$0x1]  ;;  %v1235_v38 = vld [vmem:[%s1629_s3 + $0x50] sm:$0xff] }
  0x24   :  { %981 = vmatmul.msk.bf16.vlgmr.msra.gmra.mxu0 %vm236_vm12, %v210_v45  ;;  %v153_v57 = vsel %vm1403_vm15, %v148_v52, %v152_v39  ;;  %640 = vmatpush.bf16.msra.mxu3 %v1239_v13  ;;  %v412_v35 = vsel %vm1450_vm1, 0, %v411_v33  ;;  %v1242_v39 = vld [vmem:[%s1629_s3 + $0x88] sm:$0xff]  ;;  %v1241_v44 = vld [vmem:[%s1629_s3 + $0x80] sm:$0xff] }
  0x25   :  { %1008 = vmatmul.msk.bf16.gmra.mxu1 %vm236_vm12, %v1210_v48  ;;  %v163_v58 = vsel %vm1403_vm15, %v158_v54, %v162_v53  ;;  %v208_v61 = vunpack.c.l.b16 %v153_v57  ;;  %719 = vmatpush.bf16.msrb.mxu0 %v1229_v12  ;;  %413 = vst [vmem:[#allocation3 + $0x14] sm:$0x1] %v412_v35  ;;  %v1234_v43 = vld [vmem:[%s1629_s3 + $0x48] sm:$0xff]  ;;  %v1233_v50 = vld [vmem:[%s1629_s3 + $0x40] sm:$0xff] }
  0x26   :  { %v209_v62 = vunpack.c.l.b16 %v163_v58  ;;  %810 = vmatpush.bf16.msrb.mxu1 %v1246_v14 }
  0x27   :  { %v460_v55 = vld [vmem:[#allocation3] sm:$0xf] }
  0x28   :  { %v211_v63 = vpack.c.b16 %v209_v62, %v208_v61  ;;  %641 = vmatpush.bf16.msra.mxu3 %v1238_v16 }
  0x29   :  { %720 = vmatpush.bf16.msrb.mxu0 %v1228_v15  ;;  %v464_v7 = vld [vmem:[#allocation3 + $0x8] sm:$0x1] }
  0x2a   :  { %811 = vmatpush.bf16.msrb.mxu1 %v1245_v17 }
  0x2c   :  { %642 = vmatpush.bf16.msra.mxu3 %v1237_v23 }
  0x2d   :  { %721 = vmatpush.bf16.msrb.mxu0 %v1227_v19 }
  0x2e   :  { %812 = vmatpush.bf16.msrb.mxu1 %v1244_v24 }
  0x2f   :  { %1034 = vmatmul.msk.bf16.gmra.mxu2 %vm236_vm12, %v333_v60 }
  0x30   :  { %643 = vmatpush.bf16.msra.mxu3 %v1236_v28 }
  0x31   :  { %722 = vmatpush.bf16.msrb.mxu0 %v1226_v25 }
  0x32   :  { %813 = vmatpush.bf16.msrb.mxu1 %v1243_v29  ;;  %v467_v29 = vld [vmem:[#allocation3 + $0xc] sm:$0xf] }
  0x34   :  { %982 = vmatmul.msk.bf16.gmra.mxu0 %vm236_vm12, %v211_v63  ;;  %644 = vmatpush.bf16.msra.mxu3 %v1235_v38 }
  0x35   :  { %723 = vmatpush.bf16.msrb.mxu0 %v1225_v30 }
  0x36   :  { %814 = vmatpush.bf16.msrb.mxu1 %v1242_v39 }
  0x38   :  { %645 = vmatpush.bf16.msra.mxu3 %v1234_v43 }
  0x3a   :  { %815 = vmatpush.bf16.msrb.mxu1 %v1241_v44 }
  0x3c   :  { %646 = vmatpush.bf16.msra.mxu3 %v1233_v50 }
  0x92   :  { %v309_v21 = vpop.f32.mrf.mxu1 }
  0x9a   :  { %v311_v37 = vpop.f32.mrf.mxu1 }
  0xa1   :  { %v252_v27 = vpop.f32.mrf.mxu0 }
  0xa2   :  { %v310_v31 = vadd.f32 %v309_v21, %v252_v27  ;;  %v373_v34 = vpop.f32.mrf.mxu2  ;;  %v314_v56 = vpop.f32.mrf.mxu1 }
  0xa4   :  { %v383_v36 = vadd.f32 %v373_v34, %v310_v31 }
  0xa6   :  { %v391_v40 = vadd.f32 %v1500_v32, %v383_v36 }
  0xa8   :  { %v395_v41 = vmax.f32 %v391_v40, 0.0 }
  0xa9   :  { %v254_v42 = vpop.f32.mrf.mxu0 }
  0xaa   :  { %v414_v45 = vpack.c.bf16 %v395_v41, %v395_v41  ;;  %v312_v46 = vadd.f32 %v311_v37, %v254_v42  ;;  %v375_v47 = vpop.f32.mrf.mxu2  ;;  %v316_v12 = vpop.f32.mrf.mxu1 }
  0xac   :  { %v419_v48 = vshrl.u32 %v414_v45, 16  ;;  %v384_v49 = vadd.f32 %v375_v47, %v312_v46  ;;  %v422_v52 = vshll.u32 %v414_v45, 16 }
  0xae   :  { %v421_v51 = vrot.slane %v419_v48, 7  ;;  %v392_v53 = vadd.f32 %v1500_v32, %v384_v49 }
  0xb0   :  { %v424_v57 = vor.u32 %v422_v52, %v421_v51  ;;  %v396_v58 = vmax.f32 %v392_v53, 0.0  ;;  %v425_v8 = vrot.slane %v421_v51, 4 }
  0xb1   :  { %v257_v60 = vpop.f32.mrf.mxu0 }
  0xb2   :  { %v461_v61 = vsel %vm1522_vm5, %v424_v57, %v460_v55  ;;  %v415_v62 = vpack.c.bf16 %v396_v58, %v396_v58  ;;  %v315_v63 = vadd.f32 %v314_v56, %v257_v60  ;;  %v378_v0 = vpop.f32.mrf.mxu2  ;;  %v471_v55 = vld [vmem:[#allocation3 + $0x14] sm:$0x1] }
  0xb3   :  { %462 = vst [vmem:[#allocation3] sm:$0xf] %v461_v61 }
  0xb4   :  { %v427_v1 = vshrl.u32 %v415_v62, 16  ;;  %v385_v3 = vadd.f32 %v378_v0, %v315_v63  ;;  %v430_v5 = vshll.u32 %v415_v62, 16 }
  0xb6   :  { %v429_v4 = vrot.slane %v427_v1, 7  ;;  %v393_v6 = vadd.f32 %v1500_v32, %v385_v3 }
  0xb8   :  { %v432_v9 = vor.u32 %v430_v5, %v429_v4  ;;  %v434_v10 = vrot.slane %v429_v4, 4  ;;  %v397_v11 = vmax.f32 %v393_v6, 0.0 }
  0xb9   :  { %v259_v13 = vpop.f32.mrf.mxu0 }
  0xba   :  { %v433_v14 = vsel %vm1355_vm7, %v425_v8, %v432_v9  ;;  %v465_v15 = vsel %vm1428_vm3, %v434_v10, %v464_v7  ;;  %v416_v16 = vpack.c.bf16 %v397_v11, %v397_v11  ;;  %v317_v17 = vadd.f32 %v316_v12, %v259_v13  ;;  %v474_v19 = vld [vmem:[#allocation3] sm:$0xf]  ;;  %v380_v20 = vpop.f32.mrf.mxu2 }
  0xbb   :  { %463 = vst [vmem:[#allocation3 + $0x4] sm:$0xf] %v433_v14  ;;  %v481_v21 = vshrl.u32 %v474_v19, 16  ;;  %v484_v22 = vshll.u32 %v474_v19, 16  ;;  %v528_v30 = vld [vmem:[#allocation3] sm:$0xe] }
  0xbc   :  { %466 = vst [vmem:[#allocation3 + $0x8] sm:$0x1] %v465_v15  ;;  %v436_v23 = vshrl.u32 %v416_v16, 16  ;;  %v386_v24 = vadd.f32 %v380_v20, %v317_v17  ;;  %v439_v27 = vshll.u32 %v416_v16, 16  ;;  %v1035_v40 = vrot.slane %v528_v30, 9 }
  0xbd   :  { %v483_v31 = vrot.slane %v481_v21, 4  ;;  %v486_v33 = vrot.slane %v484_v22, 5 }
  0xbe   :  { %v438_v25 = vrot.slane %v436_v23, 7  ;;  %v394_v28 = vadd.f32 %v1500_v32, %v386_v24 }
  0xbf   :  { %v487_v43 = vor.u32 %v486_v33, %v483_v31 }
  0xc0   :  { %v441_v34 = vor.u32 %v439_v27, %v438_v25  ;;  %v398_v35 = vmax.f32 %v394_v28, 0.0  ;;  %v442_v54 = vrot.slane %v438_v25, 4 }
  0xc1   :  { %v488_v58 = vrot.slane %v487_v43, 4 }
  0xc2   :  { %v468_v36 = vsel %vm1522_vm5, %v441_v34, %v467_v29  ;;  %v417_v37 = vpack.c.bf16 %v398_v35, %v398_v35  ;;  %v1223_v38 = vld [vmem:[#allocation3] sm:$0xff] }
  0xc3   :  { %v475_v39 = vld [vmem:[#allocation3 + $0x4] sm:$0xf]  ;;  %469 = vst [vmem:[#allocation3 + $0xc] sm:$0xf] %v468_v36  ;;  %v478_v41 = vld [vmem:[#allocation3 + $0x8] sm:$0x1]  ;;  %724 = vmatmul.bf16.vlgmr.msrb.gmra.mxu0 %v1223_v38 }
  0xc4   :  { %v538_v42 = vrot.slane %v475_v39, 5  ;;  %v490_v44 = vshll.u32 %v475_v39, 16  ;;  %v444_v45 = vshrl.u32 %v417_v37, 16  ;;  %v541_v32 = vrot.slane %v478_v41, 5 }
  0xc5   :  { %v494_v46 = vshrl.u32 %v475_v39, 16  ;;  %v500_v50 = vshll.u32 %v478_v41, 16  ;;  %v447_v52 = vshll.u32 %v417_v37, 16 }
  0xc6   :  { %v539_v47 = vsel %vm1393_vm13, %v1035_v40, %v538_v42  ;;  %v540_v48 = vrot.slane %v538_v42, 4  ;;  %v492_v49 = vrot.slane %v490_v44, 5  ;;  %v446_v51 = vrot.slane %v444_v45, 7  ;;  %v1256_v45 = vld [vmem:[%s1631_s5 + $0x34] sm:$0xf0] }
  0xc7   :  { %v496_v53 = vrot.slane %v494_v46, 4  ;;  %v752_v57 = vunpack.c.l.b16 %v539_v47  ;;  %v502_v1 = vrot.slane %v500_v50, 5  ;;  %v1200_v46 = vor.u32 %v1256_v45, %v1199_v59  ;;  %v1253_v50 = vld [vmem:[%s1631_s5 + $0x24] sm:$0xf] }
  0xc8   :  { %v542_v56 = vsel %vm1393_vm13, %v540_v48, %v541_v32  ;;  %v449_v60 = vor.u32 %v447_v52, %v446_v51  ;;  %v451_v61 = vrot.slane %v446_v51, 4  ;;  %v493_v0 = vsel %vm1403_vm15, %v488_v58, %v492_v49  ;;  %v1255_v32 = vld [vmem:[%s1631_s5 + $0x34] sm:$0xf]  ;;  %v1191_v48 = vld [vmem:[%s1631_s5 + $0x20] sm:$0xf] }
  0xc9   :  { %v753_v62 = vunpack.c.l.b16 %v542_v56  ;;  %v497_v63 = vor.u32 %v496_v53, %v492_v49  ;;  %v583_v11 = vunpack.c.l.b16 %v493_v0  ;;  %v1204_v47 = vor.u32 %v1255_v32, %v1201_v18  ;;  %909 = vmatpush.bf16.msrb.mxu2 %v1200_v46  ;;  %v1254_v49 = vld [vmem:[%s1631_s5 + $0x24] sm:$0xf0]  ;;  %v1193_v52 = vld [vmem:[%s1631_s5 + $0x28] sm:$0xf0]  ;;  %v1251_v56 = vld [vmem:[%s1631_s5 + $0x14] sm:$0xf] }
  0xca   :  { %v450_v3 = vsel %vm1355_vm7, %v442_v54, %v449_v60  ;;  %v472_v4 = vsel %vm1428_vm3, %v451_v61, %v471_v55  ;;  %v476_v7 = vld [vmem:[#allocation3 + $0xc] sm:$0xf]  ;;  %v1192_v51 = vor.u32 %v1254_v49, %v1191_v48  ;;  %v1196_v53 = vor.u32 %v1253_v50, %v1193_v52  ;;  %v1183_v54 = vld [vmem:[%s1631_s5 + $0x10] sm:$0xf]  ;;  %v1252_v55 = vld [vmem:[%s1631_s5 + $0x14] sm:$0xf0] }
  0xcb   :  { %v756_v5 = vpack.c.b16 %v753_v62, %v752_v57  ;;  %v498_v6 = vrot.slane %v497_v63, 4  ;;  %470 = vst [vmem:[#allocation3 + $0x10] sm:$0xf] %v450_v3  ;;  %v505_v8 = vshrl.u32 %v476_v7, 16  ;;  %v508_v9 = vshll.u32 %v476_v7, 16  ;;  %928 = vmatpush.bf16.msrb.mxu3 %v1204_v47 }
  0xcc   :  { %473 = vst [vmem:[#allocation3 + $0x14] sm:$0x1] %v472_v4  ;;  %v529_v14 = vld [vmem:[#allocation3 + $0xc] sm:$0xe]  ;;  %v1184_v57 = vor.u32 %v1252_v55, %v1183_v54  ;;  %v1185_v58 = vld [vmem:[%s1631_s5 + $0x18] sm:$0xf0] }
  0xcd   :  { %816 = vmatmul.bf16.vlgmr.msrb.gmra.mxu1 %v756_v5  ;;  %v503_v10 = vsel %vm1403_vm15, %v498_v6, %v502_v1  ;;  %v507_v26 = vrot.slane %v505_v8, 4  ;;  %v510_v15 = vrot.slane %v508_v9, 5  ;;  %v1036_v17 = vrot.slane %v529_v14, 9  ;;  %910 = vmatpush.bf16.msrb.mxu2 %v1192_v51  ;;  %v1175_v61 = vld [vmem:[%s1631_s5] sm:$0xf] }
  0xce   :  { %v584_v12 = vunpack.c.l.b16 %v503_v10  ;;  %v1188_v60 = vor.u32 %v1251_v56, %v1185_v58  ;;  %v1250_v62 = vld [vmem:[%s1631_s5 + $0x4] sm:$0xf0]  ;;  %v1249_v63 = vld [vmem:[%s1631_s5 + $0x4] sm:$0xf]  ;;  %v1177_v1 = vld [vmem:[%s1631_s5 + $0x8] sm:$0xf0] }
  0xcf   :  { %v511_v21 = vor.u32 %v510_v15, %v507_v26  ;;  %929 = vmatpush.bf16.msrb.mxu3 %v1196_v53  ;;  %v1176_v0 = vor.u32 %v1250_v62, %v1175_v61  ;;  %v1180_v3 = vor.u32 %v1249_v63, %v1177_v1 }
  0xd0   :  { %v587_v13 = vpack.c.b16 %v584_v12, %v583_v11  ;;  %v1258_v11 = vld [vmem:[%s1630_s4] ss:$0 sm:$0xff] }
  0xd1   :  { %v512_v33 = vrot.slane %v511_v21, 4  ;;  %911 = vmatpush.bf16.msrb.mxu2 %v1184_v57 }
  0xd2   :  { %647 = vmatmul.bf16.vlgmr.msra.gmra.mxu3 %v587_v13  ;;  %v1224_v2 = vld [vmem:[#allocation3 + $0xc] sm:$0xff] }
  0xd3   :  { %v477_v16 = vld [vmem:[#allocation3 + $0x10] sm:$0xf]  ;;  %v479_v19 = vld [vmem:[#allocation3 + $0x14] sm:$0x1]  ;;  %729 = vmatmul.bf16.gmra.mxu0 %v1224_v2  ;;  %930 = vmatpush.bf16.msrb.mxu3 %v1188_v60 }
  0xd4   :  { %v545_v20 = vrot.slane %v477_v16, 5  ;;  %v514_v22 = vshll.u32 %v477_v16, 16  ;;  %v518_v23 = vshrl.u32 %v477_v16, 16  ;;  %v548_v24 = vrot.slane %v479_v19, 5 }
  0xd5   :  { %v524_v25 = vshll.u32 %v479_v19, 16  ;;  %912 = vmatpush.bf16.msrb.mxu2 %v1176_v0 }
  0xd6   :  { %v546_v27 = vsel %vm1393_vm13, %v1036_v17, %v545_v20  ;;  %v547_v28 = vrot.slane %v545_v20, 4  ;;  %v516_v29 = vrot.slane %v514_v22, 5  ;;  %v520_v30 = vrot.slane %v518_v23, 4 }
  0xd7   :  { %v754_v35 = vunpack.c.l.b16 %v546_v27  ;;  %v526_v39 = vrot.slane %v524_v25, 5  ;;  %931 = vmatpush.bf16.msrb.mxu3 %v1180_v3 }
  0xd8   :  { %v549_v31 = vsel %vm1393_vm13, %v547_v28, %v548_v24  ;;  %v521_v34 = vor.u32 %v520_v30, %v516_v29  ;;  %v517_v37 = vsel %vm1403_vm15, %v512_v33, %v516_v29 }
  0xd9   :  { %v755_v36 = vunpack.c.l.b16 %v549_v31  ;;  %v585_v42 = vunpack.c.l.b16 %v517_v37 }
  0xda   :  { %v522_v38 = vrot.slane %v521_v34, 4 }
  0xdb   :  { %v757_v40 = vpack.c.b16 %v755_v36, %v754_v35  ;;  %v853_v36 = vld [vmem:[%s1632_s6] sm:$0x3] }
  0xdc   :  { %v527_v41 = vsel %vm1403_vm15, %v522_v38, %v526_v39  ;;  %v855_v37 = vperm.slane %v853_v36, 0  ;;  %v856_v38 = vperm.slane %v853_v36, 1 }
  0xdd   :  { %821 = vmatmul.bf16.gmra.mxu1 %v757_v40  ;;  %v586_v43 = vunpack.c.l.b16 %v527_v41 }
  0xdf   :  { %v588_v44 = vpack.c.b16 %v586_v43, %v585_v42 }
  0xe2   :  { %652 = vmatmul.bf16.gmra.mxu3 %v588_v44 }
 0x140   :  { %v725_v4 = vpop.f32.mrf.mxu0 }
 0x148   :  { %v727_v8 = vpop.f32.mrf.mxu0 }
 0x14a   :  { %v817_v5 = vpop.f32.mrf.mxu1 }
 0x150   :  { %v730_v2 = vpop.f32.mrf.mxu0 }
 0x152   :  { %v819_v9 = vpop.f32.mrf.mxu1 }
 0x155   :  { %v648_v6 = vpop.f32.mrf.mxu3 }
 0x156   :  { %v726_v7 = vadd.f32 %v725_v4, %v648_v6 }
 0x158   :  { %v827_v10 = vadd.f32 %v817_v5, %v726_v7  ;;  %v732_v24 = vpop.f32.mrf.mxu0 }
 0x15a   :  { %v835_v14 = vadd.f32 %v1258_v11, %v827_v10  ;;  %v822_v19 = vpop.f32.mrf.mxu1 }
 0x15c   :  { %v839_v16 = vmax.f32 %v835_v14, 0.0 }
 0x15d   :  { %v650_v12 = vpop.f32.mrf.mxu3 }
 0x15e   :  { %v728_v13 = vadd.f32 %v727_v8, %v650_v12 }
 0x160   :  { %v828_v26 = vadd.f32 %v819_v9, %v728_v13 }
 0x162   :  { %v836_v15 = vadd.f32 %v1258_v11, %v828_v26  ;;  %v824_v28 = vpop.f32.mrf.mxu1 }
 0x164   :  { %v840_v17 = vmax.f32 %v836_v15, 0.0 }
 0x165   :  { %v653_v20 = vpop.f32.mrf.mxu3 }
 0x166   :  { %v843_v21 = vpack.c.bf16 %v840_v17, %v839_v16  ;;  %v731_v22 = vadd.f32 %v730_v2, %v653_v20 }
 0x168   :  { %1205 = vmatmul.msk.bf16.vlgmr.msrb.gmra.mxu2 %vm236_vm12, %v843_v21  ;;  %1207 = vmatmul.msk.bf16.vlgmr.msrb.gmra.mxu3 %vm236_vm12, %v843_v21  ;;  %v829_v23 = vadd.f32 %v822_v19, %v731_v22 }
 0x16a   :  { %v837_v29 = vadd.f32 %v1258_v11, %v829_v23 }
 0x16c   :  { %v841_v33 = vmax.f32 %v837_v29, 0.0 }
 0x16d   :  { %v655_v25 = vpop.f32.mrf.mxu3 }
 0x16e   :  { %v733_v27 = vadd.f32 %v732_v24, %v655_v25 }
 0x170   :  { %v830_v30 = vadd.f32 %v824_v28, %v733_v27 }
 0x172   :  { %v838_v31 = vadd.f32 %v1258_v11, %v830_v30 }
 0x174   :  { %v842_v34 = vmax.f32 %v838_v31, 0.0 }
 0x176   :  { %v844_v35 = vpack.c.bf16 %v842_v34, %v841_v33 }
 0x178   :  { %1206 = vmatmul.msk.bf16.gmra.mxu2 %vm236_vm12, %v844_v35  ;;  %1208 = vmatmul.msk.bf16.gmra.mxu3 %vm236_vm12, %v844_v35 }
 0x1eb   :  { %v914_v39 = vpop.f32.mrf.mxu2  ;;  %v933_v40 = vpop.f32.mrf.mxu3 }
 0x1ec   :  { %v915_v41 = vadd.f32 %v914_v39, %v855_v37  ;;  %v934_v42 = vadd.f32 %v933_v40, %v856_v38 }
 0x1ee   :  { %v943_v43 = vpack.c.bf16 %v934_v42, %v915_v41 }
 0x1f0   :  { %947 = vst [vmem:[%s1633_s7] sm:$0xff] %v943_v43 }
 0x1f3   :  { %v916_v44 = vpop.f32.mrf.mxu2  ;;  %v935_v59 = vpop.f32.mrf.mxu3 }
 0x1f4   :  { %v917_v45 = vadd.f32 %v916_v44, %v855_v37  ;;  %v936_v32 = vadd.f32 %v935_v59, %v856_v38 }
 0x1f6   :  { %v944_v46 = vpack.c.bf16 %v936_v32, %v917_v45 }
 0x1f8   :  { %948 = vst [vmem:[%s1633_s7 + $0x8] sm:$0xff] %v944_v46 }
 0x1fb   :  { %v919_v18 = vpop.f32.mrf.mxu2  ;;  %v938_v47 = vpop.f32.mrf.mxu3 }
 0x1fc   :  { %v920_v48 = vadd.f32 %v919_v18, %v855_v37  ;;  %v939_v49 = vadd.f32 %v938_v47, %v856_v38 }
 0x1fe   :  { %v945_v50 = vpack.c.bf16 %v939_v49, %v920_v48 }
 0x200   :  { %949 = vst [vmem:[%s1633_s7 + $0x10] sm:$0xff] %v945_v50 }
 0x203   :  { %v921_v51 = vpop.f32.mrf.mxu2  ;;  %v940_v52 = vpop.f32.mrf.mxu3 }
 0x204   :  { %v922_v53 = vadd.f32 %v921_v51, %v855_v37  ;;  %v941_v54 = vadd.f32 %v940_v52, %v856_v38 }
 0x206   :  { %v946_v55 = vpack.c.bf16 %v941_v54, %v922_v53 }
 0x208   :  { %950 = vst [vmem:[%s1633_s7 + $0x18] sm:$0xff] %v946_v55 }

</bundles_post_ra>
